<compile_context>
chip_gen: v5e
topology: v5e:2x2
jax: 0.10.0
libtpu: 0.0.40
codegen_flags: <defaults>
</compile_context>

<pallas_src>
import functools

import jax
import jax.numpy as jnp
from jax import lax
from jax.experimental import pallas as pl
from jax.experimental.pallas import tpu as pltpu


def _round_up(x, m):
    return (x + m - 1) // m * m


def _vmem_budget_bytes():
    """(streaming-tile budget, vmem_limit_bytes), branched on TPU generation."""
    vmem_cap = 64 * 2 ** 20                    # conservative default (v7x-sized)
    try:
        info_fn = getattr(pltpu, "get_tpu_info", None)
        if info_fn is not None:
            vmem_cap = int(info_fn().vmem_capacity_bytes)
    except Exception:
        pass
    if vmem_cap >= 96 * 2 ** 20:               # v5e / v6e: 128 MiB VMEM
        return 32 * 2 ** 20, 96 * 2 ** 20
    return 14 * 2 ** 20, 40 * 2 ** 20          # v7x: 64 MiB VMEM


def _pick_blocks(b_sz, t, pad, per_col_bytes, budget_bytes):
    """Pick (batch_block, time_tile) under a VMEM streaming budget."""
    # --- time tile: largest multiple-of-128 divisor of T under the budget ---
    if t % 128 != 0:
        # TODO(synk): non-128-multiple T falls back to one full-time block.
        tile = t
    else:
        max_tile = max(128, (budget_bytes // max(per_col_bytes, 1)) // 128 * 128)
        tile = min(t, max_tile)
        while t % tile != 0:                   # 128 | t here, so this terminates
            tile -= 128
        if pad >= tile and tile < t:
            # TODO(synk): halo spanning more than one previous tile (huge dilation).
            tile = t
    # --- batch block: amortize the ~0.35 us per-step overhead, but keep >= 2
    #     batch blocks on the "parallel" axis so the 2nd TensorCore has work. ---
    b_blk = 1
    for cand in range(2, min(b_sz, 8) + 1):    # cap unroll depth at 8
        if b_sz % cand != 0:
            continue
        if b_sz // cand < 2:
            continue
        if cand * tile * per_col_bytes > budget_bytes:
            continue
        b_blk = cand
    return b_blk, tile


def _causal_conv1d_kernel(x_ref, w_ref, b_ref, o_ref, carry_ref, *,
                          kernel_size, dilation, pad, c_out, write_carry):
    """One grid step = (batch block, time tile).

    x_ref:     (b_blk, C_in, tT)       current time tile of the UNPADDED input
    w_ref:     (K, C_out_p, C_in)      per-tap weights, resident across the grid
    b_ref:     (C_out_p, 1)            bias
    o_ref:     (b_blk, C_out, tT)      output tile (unpadded channel dim)
    carry_ref: (b_blk, C_in, max(pad,1))  last `pad` input columns of the
                                          previous time tile (causal left halo)
    """
    x_tile = x_ref[...]                                  # (b_blk, C_in, tT)
    b_blk = x_tile.shape[0]
    t_len = x_tile.shape[-1]

    halo = None
    if pad > 0:
        # Zero the causal halo at the first time tile of every batch block.
        @pl.when(pl.program_id(1) == 0)
        def _():
            carry_ref[...] = jnp.zeros_like(carry_ref)

        halo = carry_ref[...]                            # (b_blk, C_in, pad)
        if write_carry:
            # Stash the halo for the next (sequential) time tile.
            carry_ref[...] = x_tile[:, :, t_len - pad:]

    bias = b_ref[...]                                    # (C_out_p, 1)

    for bi in range(b_blk):                              # static unroll (<= 8)
        if pad > 0:
            slab = jnp.concatenate([halo[bi], x_tile[bi]], axis=-1)  # (C_in, tT+pad)
        else:
            slab = x_tile[bi]                            # (C_in, tT)

        acc = None
        for j in range(kernel_size):                     # K accumulating matmuls
            tap = slab[:, j * dilation: j * dilation + t_len]        # (C_in, tT)
            d = jnp.dot(w_ref[j], tap, preferred_element_type=jnp.float32)
            acc = d if acc is None else acc + d          # (C_out_p, tT), f32
        acc = acc + bias
        o_ref[bi] = acc[:c_out, :].astype(o_ref.dtype)   # masked-sublane store


def causal_conv1d(x, weight, bias, *, dilation=1, time_block=None,
                  batch_block=None):
    """Causal 1D convolution.

    x:      (B, C_in, T)       float32 or bfloat16
    weight: (C_out, C_in, K)   same dtype as x
    bias:   (C_out,)
    returns (B, C_out, T)      dtype of x
    """
    b_sz, c_in, t = x.shape
    c_out, c_in_w, k = weight.shape
    assert c_in == c_in_w
    pad = (k - 1) * dilation

    # Weights/bias are tiny and VMEM-resident: pad only them (not the output).
    c_out_p = max(_round_up(c_out, 8), 8)

    # Per-tap layout: w3[j, o, c] = weight[o, c, j].
    w3 = jnp.transpose(weight, (2, 0, 1))                # (K, C_out, C_in)
    bias2d = bias.reshape(c_out, 1)
    if c_out_p != c_out:
        w3 = jnp.pad(w3, ((0, 0), (0, c_out_p - c_out), (0, 0)))
        bias2d = jnp.pad(bias2d, ((0, c_out_p - c_out), (0, 0)))

    # Per-time-column streaming VMEM estimate (double-buffered x & out tiles,
    # slab/tap temporaries, f32 accumulator), used to size the blocks.
    itemsize = jnp.dtype(x.dtype).itemsize
    per_col = (4 * c_in + 2 * c_out) * itemsize + 3 * c_out_p * 4

    budget_bytes, vmem_limit = _vmem_budget_bytes()
    b_blk, tile = _pick_blocks(b_sz, t, pad, per_col, budget_bytes)

    if time_block is not None:
        assert t % time_block == 0
        assert time_block % 128 == 0 or time_block == t
        assert time_block > pad or time_block == t
        tile = time_block
    if batch_block is not None:
        assert b_sz % batch_block == 0
        b_blk = batch_block

    n_t = t // tile
    write_carry = n_t > 1

    kernel = functools.partial(
        _causal_conv1d_kernel,
        kernel_size=k, dilation=dilation, pad=pad, c_out=c_out,
        write_carry=write_carry)

    cost = pl.CostEstimate(
        flops=2 * b_sz * c_out * k * c_in * t,
        transcendentals=0,
        bytes_accessed=(b_sz * c_in * t + b_sz * c_out * t) * itemsize
        + w3.size * jnp.dtype(w3.dtype).itemsize
        + bias2d.size * jnp.dtype(bias2d.dtype).itemsize,
    )

    out = pl.pallas_call(
        kernel,
        out_shape=jax.ShapeDtypeStruct((b_sz, c_out, t), x.dtype),
        grid_spec=pltpu.PrefetchScalarGridSpec(
            num_scalar_prefetch=0,
            grid=(b_sz // b_blk, n_t),
            in_specs=[
                # current time tile of the unpadded input (batch-blocked)
                pl.BlockSpec((b_blk, c_in, tile), lambda b, ti: (b, 0, ti)),
                # per-tap weights, resident across the whole grid
                pl.BlockSpec((k, c_out_p, c_in), lambda b, ti: (0, 0, 0)),
                # bias
                pl.BlockSpec((c_out_p, 1), lambda b, ti: (0, 0)),
            ],
            out_specs=pl.BlockSpec((b_blk, c_out, tile),
                                   lambda b, ti: (b, 0, ti)),
            scratch_shapes=[
                pltpu.VMEM((b_blk, c_in, max(pad, 1)), x.dtype)],
        ),
        compiler_params=pltpu.CompilerParams(
            # Batch axis splits across TensorCores (megacore); the time axis
            # carries the sequential causal halo -> MUST stay "arbitrary".
            dimension_semantics=("parallel", "arbitrary"),
            vmem_limit_bytes=vmem_limit,
        ),
        cost_estimate=cost,
    )(x, w3, bias2d)

    return out


def _reference_causal_conv1d(x, weight, bias, *, dilation=1):
    """Pure-JAX reference matching PyTorch Conv1d + [:, :, :-padding] (K >= 2)."""
    k = weight.shape[-1]
    padding = (k - 1) * dilation
    y = lax.conv_general_dilated(
        x, weight,
        window_strides=(1,),
        padding=[(padding, padding)],
        rhs_dilation=(dilation,),
        dimension_numbers=("NCH", "OIH", "NCH"),
    )
    y = y + bias.reshape(1, -1, 1)
    return y[:, :, :-padding]


if __name__ == "__main__":
    # Small shapes consistent with the module.
    batch, in_channels, out_channels, seq_len = 2, 4, 8, 16
    kernel_size, dilation = 3, 1

    key = jax.random.PRNGKey(0)
    kx, kw, kb = jax.random.split(key, 3)

    # Deterministic parameter init (mimics PyTorch Conv1d default uniform bound).
    bound = 1.0 / (in_channels * kernel_size) ** 0.5
    x = jax.random.normal(kx, (batch, in_channels, seq_len), dtype=jnp.float32)
    weight = jax.random.uniform(
        kw, (out_channels, in_channels, kernel_size),
        minval=-bound, maxval=bound, dtype=jnp.float32)
    bias = jax.random.uniform(
        kb, (out_channels,), minval=-bound, maxval=bound, dtype=jnp.float32)

    # 1) Small / odd-length path (single full-time block, auto batch block).
    y = jax.block_until_ready(causal_conv1d(x, weight, bias, dilation=dilation))
    y_ref = _reference_causal_conv1d(x, weight, bias, dilation=dilation)
    assert y.shape == (batch, out_channels, seq_len)
    assert jnp.allclose(y, y_ref, atol=1e-5, rtol=1e-5), "mismatch (small path)"

    # 2) Dilated conv on the small path.
    y_d = jax.block_until_ready(causal_conv1d(x, weight, bias, dilation=2))
    y_d_ref = _reference_causal_conv1d(x, weight, bias, dilation=2)
    assert jnp.allclose(y_d, y_d_ref, atol=1e-5, rtol=1e-5), "mismatch (dilated)"

    # 3) Lane-dense tiled path: carried halo across time tiles + batch block.
    seq2 = 256
    x2 = jax.random.normal(jax.random.PRNGKey(1),
                           (batch, in_channels, seq2), dtype=jnp.float32)
    y2 = jax.block_until_ready(
        causal_conv1d(x2, weight, bias, dilation=dilation,
                      time_block=128, batch_block=2))
    y2_ref = _reference_causal_conv1d(x2, weight, bias, dilation=dilation)
    assert jnp.allclose(y2, y2_ref, atol=1e-5, rtol=1e-5), "mismatch (tiled path)"

    # 4) bf16 I/O path (halves HBM traffic on v6e/v7x); f32 MXU accumulate.
    y_bf = jax.block_until_ready(
        causal_conv1d(x2.astype(jnp.bfloat16), weight.astype(jnp.bfloat16),
                      bias, dilation=dilation, time_block=128, batch_block=2))
    assert y_bf.dtype == jnp.bfloat16
    assert jnp.allclose(y_bf.astype(jnp.float32), y2_ref,
                        atol=5e-2, rtol=5e-2), "mismatch (bf16 path)"

    print("KERNEL_OK")
</pallas_src>

<mosaic_0001>
module attributes {stable_mosaic.version = 11 : i64} {
  func.func @_causal_conv1d_kernel(%arg0: i32, %arg1: i32, %arg2: memref<1x4x16xf32, #tpu.memory_space<vmem>>, %arg3: memref<3x8x4xf32, #tpu.memory_space<vmem>>, %arg4: memref<8x1xf32, #tpu.memory_space<vmem>>, %arg5: memref<1x8x16xf32, #tpu.memory_space<vmem>>, %arg6: memref<1x4x2xf32, #tpu.memory_space<vmem>>) attributes {dimension_semantics = [#tpu.dimension_semantics<parallel>, #tpu.dimension_semantics<arbitrary>], iteration_bounds = array<i64: 2, 1>, scalar_prefetch = 0 : i64, scratch_operands = 1 : i64, tpu.core_type = #tpu.core_type<tc>, window_params = [{transform_indices = @transform_0, window_bounds = array<i64: 1, 4, 16>}, {pipeline_mode = #tpu.pipeline_mode<synchronous>, transform_indices = @transform_1, window_bounds = array<i64: 3, 8, 4>}, {pipeline_mode = #tpu.pipeline_mode<synchronous>, transform_indices = @transform_2, window_bounds = array<i64: 8, 1>}, {transform_indices = @transform_3, window_bounds = array<i64: 1, 8, 16>}]} {
    %c0 = arith.constant 0 : index
    %c0_0 = arith.constant 0 : index
    %c0_1 = arith.constant 0 : index
    %0 = vector.load %arg2[%c0, %c0_0, %c0_1] : memref<1x4x16xf32, #tpu.memory_space<vmem>>, vector<1x4x16xf32>
    %c0_i32 = arith.constant 0 : i32
    %1 = arith.cmpi eq, %arg1, %c0_i32 : i32
    %2 = arith.extui %1 : i1 to i32
    %c0_i32_2 = arith.constant 0 : i32
    %3 = arith.cmpi ne, %2, %c0_i32_2 : i32
    scf.if %3 {
      %cst_20 = arith.constant 0.000000e+00 : f32
      %28 = vector.broadcast %cst_20 : f32 to vector<1x4x2xf32>
      %c0_21 = arith.constant 0 : index
      %c0_22 = arith.constant 0 : index
      %c0_23 = arith.constant 0 : index
      %29 = vector.load %arg6[%c0_21, %c0_22, %c0_23] : memref<1x4x2xf32, #tpu.memory_space<vmem>>, vector<1x4x2xf32>
      tpu.vector_store %arg6[%c0_21, %c0_22, %c0_23], %28 {strides = array<i32>} : memref<1x4x2xf32, #tpu.memory_space<vmem>>, vector<1x4x2xf32>,
    } else {
    }
    %c0_3 = arith.constant 0 : index
    %c0_4 = arith.constant 0 : index
    %c0_5 = arith.constant 0 : index
    %4 = vector.load %arg6[%c0_3, %c0_4, %c0_5] : memref<1x4x2xf32, #tpu.memory_space<vmem>>, vector<1x4x2xf32>
    %c0_6 = arith.constant 0 : index
    %c0_7 = arith.constant 0 : index
    %5 = vector.load %arg4[%c0_6, %c0_7] : memref<8x1xf32, #tpu.memory_space<vmem>>, vector<8x1xf32>
    %6 = vector.shape_cast %4 : vector<1x4x2xf32> to vector<4x2xf32>
    %7 = vector.shape_cast %0 : vector<1x4x16xf32> to vector<4x16xf32>
    %8 = tpu.concatenate %6, %7 in 1 : vector<4x2xf32>, vector<4x16xf32> -> vector<4x18xf32>
    %9 = vector.extract_strided_slice %8 {offsets = [0, 0], sizes = [4, 16], strides = [1, 1]} : vector<4x18xf32> to vector<4x16xf32>
    %c0_8 = arith.constant 0 : index
    %c0_9 = arith.constant 0 : index
    %c0_10 = arith.constant 0 : index
    %10 = vector.load %arg3[%c0_8, %c0_9, %c0_10] : memref<3x8x4xf32, #tpu.memory_space<vmem>>, vector<1x8x4xf32>
    %11 = vector.shape_cast %10 : vector<1x8x4xf32> to vector<8x4xf32>
    %cst = arith.constant dense<0.000000e+00> : vector<8x16xf32>
    %12 = tpu.matmul %11, %9, %cst {dimension_numbers = #tpu.dot_dimension_numbers<[1], [0], [0], [1], [0, 0, 1, 1], [], []>} : vector<8x4xf32>, vector<4x16xf32>, vector<8x16xf32> -> vector<8x16xf32>
    %13 = vector.extract_strided_slice %8 {offsets = [0, 1], sizes = [4, 16], strides = [1, 1]} : vector<4x18xf32> to vector<4x16xf32>
    %c1 = arith.constant 1 : index
    %c0_11 = arith.constant 0 : index
    %c0_12 = arith.constant 0 : index
    %14 = vector.load %arg3[%c1, %c0_11, %c0_12] : memref<3x8x4xf32, #tpu.memory_space<vmem>>, vector<1x8x4xf32>
    %15 = vector.shape_cast %14 : vector<1x8x4xf32> to vector<8x4xf32>
    %cst_13 = arith.constant dense<0.000000e+00> : vector<8x16xf32>
    %16 = tpu.matmul %15, %13, %cst_13 {dimension_numbers = #tpu.dot_dimension_numbers<[1], [0], [0], [1], [0, 0, 1, 1], [], []>} : vector<8x4xf32>, vector<4x16xf32>, vector<8x16xf32> -> vector<8x16xf32>
    %17 = arith.addf %12, %16 : vector<8x16xf32>
    %18 = vector.extract_strided_slice %8 {offsets = [0, 2], sizes = [4, 16], strides = [1, 1]} : vector<4x18xf32> to vector<4x16xf32>
    %c2 = arith.constant 2 : index
    %c0_14 = arith.constant 0 : index
    %c0_15 = arith.constant 0 : index
    %19 = vector.load %arg3[%c2, %c0_14, %c0_15] : memref<3x8x4xf32, #tpu.memory_space<vmem>>, vector<1x8x4xf32>
    %20 = vector.shape_cast %19 : vector<1x8x4xf32> to vector<8x4xf32>
    %cst_16 = arith.constant dense<0.000000e+00> : vector<8x16xf32>
    %21 = tpu.matmul %20, %18, %cst_16 {dimension_numbers = #tpu.dot_dimension_numbers<[1], [0], [0], [1], [0, 0, 1, 1], [], []>} : vector<8x4xf32>, vector<4x16xf32>, vector<8x16xf32> -> vector<8x16xf32>
    %22 = arith.addf %17, %21 : vector<8x16xf32>
    %23 = vector.broadcast %5 : vector<8x1xf32> to vector<8x16xf32>
    %24 = arith.addf %22, %23 : vector<8x16xf32>
    %c0_17 = arith.constant 0 : index
    %c0_18 = arith.constant 0 : index
    %c0_19 = arith.constant 0 : index
    %25 = vector.load %arg5[%c0_17, %c0_18, %c0_19] : memref<1x8x16xf32, #tpu.memory_space<vmem>>, vector<1x8x16xf32>
    %26 = vector.shape_cast %25 : vector<1x8x16xf32> to vector<8x16xf32>
    %27 = vector.shape_cast %24 : vector<8x16xf32> to vector<1x8x16xf32>
    tpu.vector_store %arg5[%c0_17, %c0_18, %c0_19], %27 {strides = array<i32>} : memref<1x8x16xf32, #tpu.memory_space<vmem>>, vector<1x8x16xf32>,
    return
  }
  func.func @transform_0(%arg0: i32, %arg1: i32) -> (i32, i32, i32) {
    %c0_i32 = arith.constant 0 : i32
    %c0_i32_0 = arith.constant 0 : i32
    return %arg0, %c0_i32, %arg1 : i32, i32, i32
  }
  func.func @transform_1(%arg0: i32, %arg1: i32) -> (i32, i32, i32) {
    %c0_i32 = arith.constant 0 : i32
    %c0_i32_0 = arith.constant 0 : i32
    %c0_i32_1 = arith.constant 0 : i32
    %c0_i32_2 = arith.constant 0 : i32
    return %c0_i32, %c0_i32_0, %c0_i32_1 : i32, i32, i32
  }
  func.func @transform_2(%arg0: i32, %arg1: i32) -> (i32, i32) {
    %c0_i32 = arith.constant 0 : i32
    %c0_i32_0 = arith.constant 0 : i32
    %c0_i32_1 = arith.constant 0 : i32
    return %c0_i32, %c0_i32_0 : i32, i32
  }
  func.func @transform_3(%arg0: i32, %arg1: i32) -> (i32, i32, i32) {
    %c0_i32 = arith.constant 0 : i32
    %c0_i32_0 = arith.constant 0 : i32
    return %arg0, %c0_i32, %arg1 : i32, i32, i32
  }
}

</mosaic_0001>

<bundles_post_ra>
// kernel: tpu_custom_call.1
= control target key start
LH: loop header
LB: loop body
LE: loop exit
PB: predicated region body
PF: predicated region fallthrough
CT: control target
= control target key end

     0   :  { %8 = vsyncpa [#allocation4], 0  ;;  %s688_s0 = inlined_call_operand.vmem [shape: f32[2,4,16], index: 0, kind: input, shape index: {}]   ;;  %s689_s1 = inlined_call_operand.vmem [shape: f32[3,8,4], index: 1, kind: input, shape index: {}]   ;;  %s690_s2 = inlined_call_operand.vmem [shape: f32[8,1], index: 2, kind: input, shape index: {}]   ;;  %s691_s3 = inlined_call_operand.hbm [shape: f32[2,8,16], index: 3, kind: output, shape index: {}]  }
   0x1   :  { %10 = vsyncpa [#allocation4 + $0x1], 0  ;;  %s576_s12 = smov 0   ;;  %s578_s13 = smov 0  }
   0x2   :  { %s580_s14 = smov 0   ;;  %s582_s15 = smov 0  }
   0x3   :  { %s584_s16 = smov 0   ;;  %s586_s17 = smov 0  }
   0x4 LB: > { %s390_s18 = sadd.s32 4294967295, %s549_s17   ;;  %s391_s19 = sadd.s32 4294967294, %s549_s17   ;;  %s549_s17 = sphi %s586_s17, %s16_s17   ;;  %s545_s16 = sphi %s584_s16, %s698_s16   ;;  %s541_s15 = sphi %s582_s15, %s697_s15   ;;  %s537_s14 = sphi %s580_s14, %s696_s14   ;;  %s533_s13 = sphi %s578_s13, %s695_s13   ;;  %s529_s12 = sphi %s576_s12, %s694_s12  }
   0x5   : > { %s28_s20 = sadd.s32 1, %s545_s16  ;;  %s107_s21 = sadd.s32 1, %s537_s14 }
   0x6   : > { %p30_p0 = scmp.ge.s32.totalorder %s28_s20, 2  ;;  %p117_p1 = scmp.ne.s32.totalorder %s537_s14, %s533_s13 }
   0x7   : > { %p118_p2 = scmp.eq.s32.totalorder %s390_s18, 1  ;;  %p123_p3 = scmp.ne.s32.totalorder %s533_s13, %s529_s12 }
   0x8   : > { %s700_s20 = smov (%p30_p0, %s28_s20), 0  ;;  %p124_p5 = scmp.eq.s32.totalorder %s391_s19, 1 }
   0x9   : > { %p616_p4 = por %p118_p2, %p117_p1  ;;  %s102_s23 = ssub.s32 %s545_s16, %s700_s20 }
   0xa   : > { %p394_p6 = scmp.ge.s32.totalorder %s549_s17, 1  ;;  %p105_p7 = scmp.eq.s32.totalorder %s102_s23, 0 }
   0xb   : > { %p623_p8 = por %p124_p5, %p123_p3  ;;  %p158_p9 = scmp.lt.s32.totalorder %s549_s17, 3 }
   0xc   : > { %s629_s25 = scalar_select %p105_p7, %s537_s14, %s107_s21  }
   0xd   : > { %p159_p10 = pnand %p394_p6, %p158_p9 }
   0xe   : > { %p184_p11 = scmp.lt.s32.totalorder (!%p159_p10), %s541_s15, 1  ;;  %s551_s4 = smov (!%p159_p10), 2  }
   0xf   : > { %162 = sbr.rel (%p159_p10) target bundleno = 396 (0x18c), region = 32  ;;  %s553_s5 = smov (!%p159_p10), 127  }
  0x10   : > { %s554_s6 = smov (!%p159_p10), 126   ;;  %s181_s23 = sand.u32 (!%p159_p10), 1, %s533_s13  }
  0x11   : > { %s303_s7 = scalar_lea.sflag (!%p159_p10), [#allocation4], %s181_s23  ;;  %s491_s11 = scalar_lea.hbm (!%p159_p10), %s691_s3, 16 }
  0x14   : > { %s185_s26 = scalar_select %p184_p11, %s541_s15, 1  ;;  %vm196_vm0 = vcmask 11264   ;;  %v552_v1 = vmov 0.0   ;;  %vm204_vm1 = vcmask 15360   ;;  %vm216_vm2 = vcmask 1043456   ;;  %v206_v5 = vld [vmem:[%s689_s1] sm:$0xff] }
  0x15   : > { %197 = vst.msk [vmem:[#allocation2] sm:$0xf] %vm196_vm0, %v552_v1  ;;  %vm212_vm3 = vcmask 31744   ;;  %v199_v6 = vld [vmem:[%s690_s2] sm:$0xff]  ;;  %v555_v7 = vmov 0   ;;  %v402_v8 = vld [vmem:[%s689_s1 + $0x10] sm:$0xff] }
  0x16   : > { %s396_s27 = sshll.u32 %s185_s26, 2  ;;  %469 = vset.pattern.permute.xlu1 %v555_v7  ;;  %470 = vset.pattern.permute.xlu0 %v555_v7  ;;  %v397_v9 = vld [vmem:[%s689_s1 + $0x8] sm:$0xff]  ;;  %s395_s26 = sshll.u32 %s181_s23, 3  ;;  %vm300_vm4 = vcmask 130048  }
  0x17   : > { %s190_s30 = scalar_lea.vmem %s688_s0, %s396_s27  ;;  %s406_s27 = sshll.u32 %s541_s15, 3 }
  0x18   : > { %v191_v0 = vld [vmem:[%s190_s30] sm:$0xf]  ;;  %s314_s30 = scalar_lea.hbm %s691_s3, %s406_s27 }
  0x19   : > { %201 = vrot.lane.b32.xlu0 %v191_v0, %s551_s4  ;;  %s183_s4 = scalar_lea.vmem [#allocation3], %s395_s26 }
  0x1c   : > { %v198_v2 = vld [vmem:[#allocation2] sm:$0xf] }
  0x8b   : > { %v202_v3 = vpop.permute.xlu0 %201 }
  0x8c   : > { %v205_v4 = vsel %vm204_vm1, %v198_v2, %v202_v3 }
  0x8d   : > { %210 = vrot.lane.b32.xlu1 %v205_v4, %s553_s5  ;;  %266 = vrot.lane.b32.xlu0 %v205_v4, %s554_s6  ;;  %s316_s5 = sshll.u32 %s183_s4, 4  ;;  %s318_s6 = sshll.u32 %s314_s30, 4  ;;  %s317_s5 = int_to_ptr.vmem [resolvable:$true] %s316_s5  ;;  %s319_s6 = int_to_ptr.hbm [resolvable:$true] %s318_s6 }
  0x8e   : > { %400 = vmatpush.msk.msra.mxu1 %vm216_vm2, %v205_v4  ;;  %s485_s8 = sshra.s32 %s319_s6, 4  ;;  %s486_s8 = int_to_ptr.hbm [resolvable:$true] %s485_s8 }
  0x8f   : > { %401 = vmatmul.msk.f32.vlgmr.msra.gmra.mxu1 %vm212_vm3, %v206_v5  ;;  %s487_s15 = scalar_lea.hbm %s486_s8, 8  ;;  %p492_p1 = scmp.lt.s32.totalorder %s486_s8, %s691_s3 }
  0x90   : > { %p488_p12 = scmp.ne.s32.totalorder %s486_s8, %s487_s15  ;;  %p493_p2 = scmp.lt.s32.totalorder %s491_s11, %s487_s15 }
  0x92   : > { %p489_p13 = pnand %p488_p12, %p616_p4  ;;  %p494_p3 = por %p493_p2, %p492_p1 }
  0x94   : > { %p490_p0 = pneg %p489_p13 }
  0x95   : > { %296 = vperm.xlu1 %469, %v199_v6  }
  0x96   : > { %p495_p5 = pnand %p494_p3, %p490_p0 }
  0xff   : > { %v211_v10 = vpop.permute.xlu1 %210  ;;  %v267_v11 = vpop.permute.xlu0 %266 }
 0x100   : > { %398 = vmatpush.msk.msra.mxu0 %vm216_vm2, %v211_v10  ;;  %403 = vmatpush.msk.msra.mxu2 %vm216_vm2, %v267_v11 }
 0x101   : > { %404 = vmatmul.msk.f32.vlgmr.msra.gmra.mxu2 %vm212_vm3, %v402_v8  ;;  %399 = vmatmul.msk.f32.vlgmr.msra.gmra.mxu0 %vm212_vm3, %v397_v9 }
 0x107   : > { %v297_v16 = vpop.permute.xlu1 %296 }
 0x10c   : > { %v261_v13 = vpop.f32.mrf.mxu1 }
 0x17e   : > { %v236_v12 = vpop.f32.mrf.mxu0 }
 0x17f   : > { %v262_v14 = vadd.f32 %v261_v13, %v236_v12 }
 0x184   : > { %v290_v15 = vpop.f32.mrf.mxu2 }
 0x185   : > { %v293_v17 = vadd.f32 %v290_v15, %v262_v14 }
 0x187   : > { %v299_v18 = vadd.f32 %v297_v16, %v293_v17 }
 0x189   : > { %301 = vst.msk [vmem:[%s183_s4] sm:$0xff] %vm300_vm4, %v299_v18 }
 0x18a   : > { %498 = shalt.err (!%p495_p5)
}
 0x18b   : > { %409 = dma.vmem_to_hbm [thread:$0]  (%p616_p4), %s317_s5, 128, %s319_s6, %s303_s7  }
 0x18c PF: > { %p415_p6 = scmp.ge.s32.totalorder %s549_s17, 2  ;;  %s330_s21 = sand.u32 1, %s529_s12  }
 0x18d   : > { %s331_s23 = scalar_lea.sflag [#allocation4], %s330_s21 }
 0x18e   : > { %p412_p7 = pnand %p415_p6, %p623_p8 }
 0x190   : > { %p413_p9 = pneg %p412_p7 }
 0x192   : > { %524 = dma.done.wait (%p413_p9), %s331_s23, 128  }
 0x193   : > { %526 = vsyncadd (%p413_p9), %s331_s23, 4294967168  ;;  %s16_s17 = sadd.s32 1, %s549_s17   ;;  %s694_s12 = smov %s533_s13 }
 0x194   : > { %p13_p10 = scmp.ge.s32.totalorder %s16_s17, 4   ;;  %s695_s13 = smov %s537_s14 }
 0x195   : > { %s696_s14 = smov %s629_s25  ;;  %s697_s15 = smov %s545_s16 }
 0x196   : > { %s698_s16 = smov %s700_s20  ;;  %15 = sbr.rel (!%p13_p10) target bundleno = 4 (0x4), region = 73 }
 0x19b   :  { %337 = vsyncpa [#allocation4], 1 }
 0x19c   :  { %339 = vsyncpa [#allocation4 + $0x1], 1 }

</bundles_post_ra>
